<compile_context>
chip_gen: v7x
topology: tpu7x:2x2x1
jax: 0.10.0
libtpu: 0.0.40
codegen_flags: <defaults>
</compile_context>

<pallas_src>
import functools

import jax
import jax.numpy as jnp
from jax.experimental import pallas as pl
from jax.experimental.pallas import tpu as pltpu

LANES = 128          # lane width of a vreg
SUBLANE_PACK = 32    # row granularity: multiple of 8 (f32/i32) and 32 (int8 tiling)


def _round_up(x, m):
    return ((x + m - 1) // m) * m


def binary_classifier_kernel(logits_ref, label_ref, row_loss_ref, pred_ref, *,
                             n, n_pad):
    i = pl.program_id(0)
    r, l = label_ref.shape                     # rows per block, 128 lanes

    l0 = logits_ref[0].astype(jnp.float32)     # (r, l) class-0 logits
    l1 = logits_ref[1].astype(jnp.float32)     # (r, l) class-1 logits
    is_pos = label_ref[...] != 0               # binary_label = (label != 0)

    # Cross entropy with exactly 2 classes:
    #   lse - picked = softplus(other - picked);   d = other - picked
    d = jnp.where(is_pos, l0 - l1, l1 - l0)
    per_example = jnp.maximum(d, 0.0) + jnp.log1p(jnp.exp(-jnp.abs(d)))

    # argmax over the 2 classes; ties resolve to index 0 (first max, like torch).
    pred_ref[...] = (l1 > l0).astype(pred_ref.dtype)

    def _store(vals):
        # Per-row partial loss sums (lane reduction only); final sum is in wrapper.
        row_loss_ref[...] = jnp.sum(vals, axis=-1, keepdims=True)

    if n == n_pad:
        # Static: no padded tail anywhere -> no masking on any step.
        _store(per_example)
    else:
        last = pl.num_programs(0) - 1

        @pl.when(i != last)
        def _full_tile():
            _store(per_example)

        @pl.when(i == last)
        def _tail_tile():
            rows = jax.lax.broadcasted_iota(jnp.int32, (r, l), 0) + i * r
            cols = jax.lax.broadcasted_iota(jnp.int32, (r, l), 1)
            valid = rows * l + cols < n
            _store(jnp.where(valid, per_example, 0.0))


@functools.partial(jax.jit, static_argnames=("block_rows",))
def binary_classifier_forward(bag_embedding, batch_label, block_rows=2048):
    """Returns (loss: f32 scalar, output: int32 [N]) matching forward()."""
    n, c = bag_embedding.shape
    assert c == 2, "BinaryClassifier expects 2-class logits"

    block_rows = max(SUBLANE_PACK, _round_up(block_rows, SUBLANE_PACK))
    rows_needed = pl.cdiv(n, LANES)
    r = min(block_rows, _round_up(rows_needed, SUBLANE_PACK))
    num_blocks = pl.cdiv(rows_needed, r)
    total_rows = num_blocks * r
    n_pad = total_rows * LANES

    # Layout plumbing (fuses into one XLA copy per array):
    #   [N, 2] -> (2, total_rows, 128);  labels -> (total_rows, 128).
    logits = jnp.pad(bag_embedding.T, ((0, 0), (0, n_pad - n)))
    logits = logits.reshape(2, total_rows, LANES)
    labels = jnp.pad(batch_label.astype(jnp.int32), (0, n_pad - n))
    labels = labels.reshape(total_rows, LANES)

    kernel = functools.partial(binary_classifier_kernel, n=n, n_pad=n_pad)
    row_loss, pred = pl.pallas_call(
        kernel,
        out_shape=(
            jax.ShapeDtypeStruct((total_rows, 1), jnp.float32),
            jax.ShapeDtypeStruct((total_rows, LANES), jnp.int8),
        ),
        grid_spec=pltpu.PrefetchScalarGridSpec(
            num_scalar_prefetch=0,
            grid=(num_blocks,),
            in_specs=[
                pl.BlockSpec((2, r, LANES), lambda i: (0, i, 0)),
                pl.BlockSpec((r, LANES), lambda i: (i, 0)),
            ],
            out_specs=(
                pl.BlockSpec((r, 1), lambda i: (i, 0)),
                pl.BlockSpec((r, LANES), lambda i: (i, 0)),
            ),
        ),
        compiler_params=pltpu.CompilerParams(
            dimension_semantics=("parallel",)),
    )(logits, labels)

    loss = jnp.sum(row_loss) / n
    output = pred.reshape(-1)[:n].astype(jnp.int32)
    return loss, output


def reference_forward(bag_embedding, batch_label):
    """Plain-JAX reference for verification."""
    logits = bag_embedding.astype(jnp.float32)
    binary_label = jnp.where(batch_label != 0,
                             jnp.ones_like(batch_label), batch_label)
    lse = jax.scipy.special.logsumexp(logits, axis=1)
    picked = jnp.take_along_axis(logits, binary_label[:, None], axis=1)[:, 0]
    loss = jnp.mean(lse - picked)
    output = jnp.argmax(logits, axis=1).astype(jnp.int32)
    return loss, output


def _check(n, key_e, key_l, **kw):
    bag = jax.random.normal(key_e, (n, 2), dtype=jnp.float32)
    lab = jax.random.randint(key_l, (n,), 0, 4, dtype=jnp.int32)
    loss, out = binary_classifier_forward(bag, lab, **kw)
    jax.block_until_ready((loss, out))
    rl, ro = reference_forward(bag, lab)
    assert jnp.allclose(loss, rl, atol=1e-5, rtol=1e-5), (n, loss, rl)
    assert jnp.array_equal(out, ro), (n, out, ro)


if __name__ == "__main__":
    key = jax.random.PRNGKey(0)
    k1, k2, k3, k4, k5 = jax.random.split(key, 5)

    C, HIDDEN = 2, 32
    # Deterministic init of ffn_binary (constructed but unused by forward(),
    # exactly as in the PyTorch module).
    ffn_w = jax.random.normal(k5, (HIDDEN, C), dtype=jnp.float32) * 0.02
    ffn_b = jnp.zeros((C,), dtype=jnp.float32)
    del ffn_w, ffn_b

    # Small case matching module-scale shapes (batch of 8 bag embeddings -> 2 logits).
    _check(8, k1, k2)
    # Ragged tail inside a single block.
    _check(300, k3, k2)
    # Exact-fit case (exercises the static "no mask" fast path).
    _check(32 * 128, k4, k2)
    # Multi-block ragged case with small blocks (exercises the parallel grid,
    # per-block partial sums and last-step-only masking).
    _check(9000, k1, k3, block_rows=32)

    print("KERNEL_OK")
</pallas_src>

<mosaic_0001>
module attributes {stable_mosaic.version = 11 : i64} {
  func.func @binary_classifier_kernel(%arg0: i32, %arg1: memref<2x32x128xf32, #tpu.memory_space<vmem>>, %arg2: memref<32x128xi32, #tpu.memory_space<vmem>>, %arg3: memref<32x1xf32, #tpu.memory_space<vmem>>, %arg4: memref<32x128xi8, #tpu.memory_space<vmem>>) attributes {dimension_semantics = [#tpu.dimension_semantics<parallel>], iteration_bounds = array<i64: 1>, scalar_prefetch = 0 : i64, scratch_operands = 0 : i64, tpu.core_type = #tpu.core_type<tc>, window_params = [{transform_indices = @transform_0, window_bounds = array<i64: 2, 32, 128>}, {transform_indices = @transform_1, window_bounds = array<i64: 32, 128>}, {transform_indices = @transform_2, window_bounds = array<i64: 32, 1>}, {transform_indices = @transform_3, window_bounds = array<i64: 32, 128>}]} {
    %c0 = arith.constant 0 : index
    %c0_0 = arith.constant 0 : index
    %c0_1 = arith.constant 0 : index
    %0 = vector.load %arg1[%c0, %c0_0, %c0_1] : memref<2x32x128xf32, #tpu.memory_space<vmem>>, vector<1x32x128xf32>
    %1 = vector.shape_cast %0 : vector<1x32x128xf32> to vector<32x128xf32>
    %c1 = arith.constant 1 : index
    %c0_2 = arith.constant 0 : index
    %c0_3 = arith.constant 0 : index
    %2 = vector.load %arg1[%c1, %c0_2, %c0_3] : memref<2x32x128xf32, #tpu.memory_space<vmem>>, vector<1x32x128xf32>
    %3 = vector.shape_cast %2 : vector<1x32x128xf32> to vector<32x128xf32>
    %c0_4 = arith.constant 0 : index
    %c0_5 = arith.constant 0 : index
    %4 = vector.load %arg2[%c0_4, %c0_5] : memref<32x128xi32, #tpu.memory_space<vmem>>, vector<32x128xi32>
    %c0_i32 = arith.constant 0 : i32
    %5 = vector.broadcast %c0_i32 : i32 to vector<32x128xi32>
    %6 = arith.cmpi ne, %4, %5 : vector<32x128xi32>
    %7 = arith.subf %1, %3 : vector<32x128xf32>
    %8 = arith.subf %3, %1 : vector<32x128xf32>
    %9 = arith.select %6, %7, %8 : vector<32x128xi1>, vector<32x128xf32>
    %cst = arith.constant 0.000000e+00 : f32
    %10 = vector.broadcast %cst : f32 to vector<32x128xf32>
    %11 = arith.maximumf %9, %10 : vector<32x128xf32>
    %12 = math.absf %9 : vector<32x128xf32>
    %cst_6 = arith.constant 0.000000e+00 : f32
    %13 = vector.broadcast %cst_6 : f32 to vector<32x128xf32>
    %14 = arith.subf %13, %12 : vector<32x128xf32>
    %15 = math.exp %14 : vector<32x128xf32>
    %16 = math.log1p %15 : vector<32x128xf32>
    %17 = arith.addf %11, %16 : vector<32x128xf32>
    %18 = arith.cmpf ogt, %3, %1 : vector<32x128xf32>
    %19 = arith.extui %18 : vector<32x128xi1> to vector<32x128xi8>
    %c0_7 = arith.constant 0 : index
    %c0_8 = arith.constant 0 : index
    %20 = vector.load %arg4[%c0_7, %c0_8] : memref<32x128xi8, #tpu.memory_space<vmem>>, vector<32x128xi8>
    tpu.vector_store %arg4[%c0_7, %c0_8], %19 {strides = array<i32>} : memref<32x128xi8, #tpu.memory_space<vmem>>, vector<32x128xi8>,
    %c0_i32_9 = arith.constant 0 : i32
    %21 = arith.cmpi ne, %arg0, %c0_i32_9 : i32
    %22 = arith.extui %21 : i1 to i32
    %c0_i32_10 = arith.constant 0 : i32
    %23 = arith.cmpi ne, %22, %c0_i32_10 : i32
    scf.if %23 {
      %cst_13 = arith.constant dense<0.000000e+00> : vector<32xf32>
      %27 = vector.multi_reduction <add>, %17, %cst_13 [1] : vector<32x128xf32> to vector<32xf32>
      %28 = vector.shape_cast %27 : vector<32xf32> to vector<32x1xf32>
      %c0_14 = arith.constant 0 : index
      %c0_15 = arith.constant 0 : index
      %29 = vector.load %arg3[%c0_14, %c0_15] : memref<32x1xf32, #tpu.memory_space<vmem>>, vector<32x1xf32>
      tpu.vector_store %arg3[%c0_14, %c0_15], %28 {strides = array<i32>} : memref<32x1xf32, #tpu.memory_space<vmem>>, vector<32x1xf32>,
    } else {
    }
    %c0_i32_11 = arith.constant 0 : i32
    %24 = arith.cmpi eq, %arg0, %c0_i32_11 : i32
    %25 = arith.extui %24 : i1 to i32
    %c0_i32_12 = arith.constant 0 : i32
    %26 = arith.cmpi ne, %25, %c0_i32_12 : i32
    scf.if %26 {
      %27 = tpu.iota {dimensions = array<i32: 0>} : vector<32x128xi32>
      %c32_i32 = arith.constant 32 : i32
      %28 = arith.muli %arg0, %c32_i32 : i32
      %29 = vector.broadcast %28 : i32 to vector<32x128xi32>
      %30 = arith.addi %27, %29 : vector<32x128xi32>
      %31 = tpu.iota {dimensions = array<i32: 1>} : vector<32x128xi32>
      %c128_i32 = arith.constant 128 : i32
      %32 = vector.broadcast %c128_i32 : i32 to vector<32x128xi32>
      %33 = arith.muli %30, %32 : vector<32x128xi32>
      %34 = arith.addi %33, %31 : vector<32x128xi32>
      %c8_i32 = arith.constant 8 : i32
      %35 = vector.broadcast %c8_i32 : i32 to vector<32x128xi32>
      %36 = arith.cmpi slt, %34, %35 : vector<32x128xi32>
      %cst_13 = arith.constant 0.000000e+00 : f32
      %37 = vector.broadcast %cst_13 : f32 to vector<32x128xf32>
      %38 = arith.select %36, %17, %37 : vector<32x128xi1>, vector<32x128xf32>
      %cst_14 = arith.constant dense<0.000000e+00> : vector<32xf32>
      %39 = vector.multi_reduction <add>, %38, %cst_14 [1] : vector<32x128xf32> to vector<32xf32>
      %40 = vector.shape_cast %39 : vector<32xf32> to vector<32x1xf32>
      %c0_15 = arith.constant 0 : index
      %c0_16 = arith.constant 0 : index
      %41 = vector.load %arg3[%c0_15, %c0_16] : memref<32x1xf32, #tpu.memory_space<vmem>>, vector<32x1xf32>
      tpu.vector_store %arg3[%c0_15, %c0_16], %40 {strides = array<i32>} : memref<32x1xf32, #tpu.memory_space<vmem>>, vector<32x1xf32>,
    } else {
    }
    return
  }
  func.func @transform_0(%arg0: i32) -> (i32, i32, i32) {
    %c0_i32 = arith.constant 0 : i32
    %c0_i32_0 = arith.constant 0 : i32
    %c0_i32_1 = arith.constant 0 : i32
    return %c0_i32, %arg0, %c0_i32_0 : i32, i32, i32
  }
  func.func @transform_1(%arg0: i32) -> (i32, i32) {
    %c0_i32 = arith.constant 0 : i32
    %c0_i32_0 = arith.constant 0 : i32
    return %arg0, %c0_i32 : i32, i32
  }
  func.func @transform_2(%arg0: i32) -> (i32, i32) {
    %c0_i32 = arith.constant 0 : i32
    %c0_i32_0 = arith.constant 0 : i32
    return %arg0, %c0_i32 : i32, i32
  }
  func.func @transform_3(%arg0: i32) -> (i32, i32) {
    %c0_i32 = arith.constant 0 : i32
    %c0_i32_0 = arith.constant 0 : i32
    return %arg0, %c0_i32 : i32, i32
  }
}

</mosaic_0001>

<bundles_post_ra>
// kernel: binary_classifier_forward.1
= control target key start
LH: loop header
LB: loop body
LE: loop exit
PB: predicated region body
PF: predicated region fallthrough
CT: control target
= control target key end

     0   :  { %v220_v34 = vmov 0   ;;  %v149_v39 = vlaneseq  ;;  %s329_s0 = inlined_call_operand.vmem [shape: f32[2,32,128], index: 0, kind: input, shape index: {}]   ;;  %s330_s1 = inlined_call_operand.vmem [shape: s32[32,128], index: 1, kind: input, shape index: {}]   ;;  %s331_s3 = inlined_call_operand.vmem [shape: s8[32,128], index: 3, kind: output, shape index: {1}]   ;;  %s332_s2 = inlined_call_operand.vmem [shape: f32[32,1], index: 2, kind: output, shape index: {0}]  }
   0x1   :  { %v17_v0 = vld [vmem:[%s329_s0 + $0x10] sm:$0xff]  ;;  %v15_v5 = vld [vmem:[%s329_s0] sm:$0xff]  ;;  %v18_v9 = vld [vmem:[%s329_s0 + $0x18] sm:$0xff] }
   0x2   :  { %v201_v1 = vld [vmem:[%s329_s0 + $0x30] sm:$0xff]  ;;  %v199_v6 = vld [vmem:[%s329_s0 + $0x20] sm:$0xff]  ;;  %v202_v10 = vld [vmem:[%s329_s0 + $0x38] sm:$0xff]  ;;  %v150_v50 = vshrl.u32 %v149_v39, 7  ;;  %v161_v61 = vand.u32 127, %v149_v39 }
   0x3   :  { %v26_v2 = vld [vmem:[%s330_s1 + $0x10] sm:$0xff]  ;;  %v34_v3 = vsub.f32 %v17_v0, %v201_v1  ;;  %v38_v4 = vsub.f32 %v201_v1, %v17_v0  ;;  %v24_v7 = vld [vmem:[%s330_s1] sm:$0xff]  ;;  %v32_v8 = vsub.f32 %v15_v5, %v199_v6  ;;  %v27_v11 = vld [vmem:[%s330_s1 + $0x18] sm:$0xff]  ;;  %v36_v13 = vsub.f32 %v199_v6, %v15_v5 }
   0x4   :  { %vm30_vm0 = vcmp.ne.s32.totalorder %v26_v2, 0  ;;  %vm28_vm1 = vcmp.ne.s32.totalorder %v24_v7, 0  ;;  %vm31_vm2 = vcmp.ne.s32.totalorder %v27_v11, 0  ;;  %v35_v16 = vsub.f32 %v18_v9, %v202_v10  ;;  %v16_v20 = vld [vmem:[%s329_s0 + $0x8] sm:$0xff] }
   0x5   :  { %v268_v12 = vsel %vm30_vm0, %v34_v3, %v38_v4  ;;  %v271_v15 = vsel %vm28_vm1, %v32_v8, %v36_v13  ;;  %v39_v17 = vsub.f32 %v202_v10, %v18_v9  ;;  %v200_v21 = vld [vmem:[%s329_s0 + $0x28] sm:$0xff]  ;;  %vm106_vm3 = vcmp.gt.f32.partialorder %v201_v1, %v17_v0 }
   0x6   :  { %v50_v14 = vand.u32 2147483647, %v268_v12  ;;  %v48_v19 = vand.u32 2147483647, %v271_v15  ;;  %v25_v22 = vld [vmem:[%s330_s1 + $0x8] sm:$0xff]  ;;  %vm107_vm4 = vcmp.gt.f32.partialorder %v202_v10, %v18_v9  ;;  %vm104_vm5 = vcmp.gt.f32.partialorder %v199_v6, %v15_v5 }
   0x7   :  { %v283_v23 = vsel %vm31_vm2, %v35_v16, %v39_v17  ;;  %vm29_vm6 = vcmp.ne.s32.totalorder %v25_v22, 0  ;;  %v33_v27 = vsub.f32 %v16_v20, %v200_v21  ;;  %vm109_vm7 = vmpackc.low %vm107_vm4, %vm106_vm3  ;;  %v37_v29 = vsub.f32 %v200_v21, %v16_v20 }
   0x8   :  { %v54_v18 = vsub.f32 0.0, %v50_v14  ;;  %v52_v25 = vsub.f32 0.0, %v48_v19  ;;  %v51_v26 = vand.u32 2147483647, %v283_v23  ;;  %vm105_vm8 = vcmp.gt.f32.partialorder %v200_v21, %v16_v20 }
   0x9   :  { %v286_v31 = vsel %vm29_vm6, %v33_v27, %v37_v29  ;;  %vm108_vm9 = vmpackc.low %vm105_vm8, %vm104_vm5  ;;  %v152_v57 = vadd.s32 16, %v150_v50  ;;  %v153_v0 = vadd.s32 24, %v150_v50  ;;  %v162_v5 = vmul.u32 128, %v150_v50 }
   0xa   :  { %v60_v24 = vmul.f32 1.442695, %v54_v18  ;;  %v56_v28 = vmul.f32 1.442695, %v52_v25  ;;  %v55_v30 = vsub.f32 0.0, %v51_v26  ;;  %vm110_vm10 = vmpackc.even %vm109_vm7, %vm108_vm9  ;;  %v46_v7 = vmax.f32 %v268_v12, 0.0 }
   0xb   :  { %v49_v33 = vand.u32 2147483647, %v286_v31  ;;  %v111_v35 = vsel %vm110_vm10, 16843009, %v220_v34  ;;  %v164_v63 = vmul.u32 128, %v152_v57  ;;  %v165_v11 = vmul.u32 128, %v153_v0 }
   0xc   :  { %204 = vpow2.f32 %v60_v24  ;;  %v62_v32 = vmul.f32 1.442695, %v55_v30  ;;  %v112_v37 = vunpack.c.0.s8 %v111_v35  ;;  %v113_v38 = vunpack.c.1.s8 %v111_v35 }
   0xd   :  { %206 = vpow2.f32 %v56_v28  ;;  %v53_v36 = vsub.f32 0.0, %v49_v33  ;;  %v114_v40 = vunpack.c.2.s8 %v111_v35  ;;  %v115_v41 = vunpack.c.3.s8 %v111_v35 }
   0xe   :  { %208 = vpow2.f32 %v62_v32  ;;  %v116_v43 = vpack.c.b16 %v112_v37, %v112_v37  ;;  %v118_v44 = vpack.c.b16 %v113_v38, %v113_v38  ;;  %v168_v10 = vadd.s32 %v164_v63, %v161_v61 }
   0xf   :  { %v58_v42 = vmul.f32 1.442695, %v53_v36  ;;  %v120_v45 = vpack.c.b16 %v114_v40, %v114_v40  ;;  %v122_v46 = vpack.c.b16 %v115_v41, %v115_v41  ;;  %v151_v18 = vadd.s32 8, %v150_v50 }
  0x10   :  { %v117_v47 = vpack.c.b8 %v116_v43, %v116_v43  ;;  %v119_v48 = vpack.c.b8 %v118_v44, %v118_v44  ;;  %v166_v21 = vadd.s32 %v162_v5, %v161_v61  ;;  %v44_v12 = vmax.f32 %v271_v15, 0.0 }
  0x11   :  { %210 = vpow2.f32 %v58_v42  ;;  %v121_v51 = vpack.c.b8 %v120_v45, %v120_v45  ;;  %v123_v52 = vpack.c.b8 %v122_v46, %v122_v46  ;;  %v47_v26 = vmax.f32 %v283_v23, 0.0 }
  0x12   :  { %124 = vst [vmem:[%s331_s3] sm:$0x3] %v117_v47  ;;  %125 = vst [vmem:[%s331_s3 + $0x2] sm:$0x3] %v119_v48  ;;  %vm172_vm13 = vcmp.lt.s32.totalorder %v168_v10, 8  ;;  %v169_v29 = vadd.s32 %v165_v11, %v161_v61  ;;  %v163_v34 = vmul.u32 128, %v151_v18  ;;  %vm170_vm14 = vcmp.lt.s32.totalorder %v166_v21, 8 }
  0x13   :  { %126 = vst [vmem:[%s331_s3 + $0x4] sm:$0x3] %v121_v51  ;;  %127 = vst [vmem:[%s331_s3 + $0x6] sm:$0x3] %v123_v52  ;;  %v45_v45 = vmax.f32 %v286_v31, 0.0  ;;  %vm186_vm3 = vcmask 7168  }
  0x14   :  { %vm173_vm0 = vcmp.lt.s32.totalorder %v169_v29, 8  ;;  %v167_v42 = vadd.s32 %v163_v34, %v161_v61 }
  0x16   :  { %v205_v49 = vpop.eup %204  ;;  %vm171_vm2 = vcmp.lt.s32.totalorder %v167_v42, 8 }
  0x17   :  { %v82_v53 = vadd.f32 1.0, %v205_v49  ;;  %v207_v54 = vpop.eup %206  ;;  %v85_v56 = vmul.f32 -0.5, %v205_v49  ;;  %v88_v2 = vand.u32 2147483647, %v205_v49 }
  0x18   :  { %v64_v55 = vadd.f32 1.0, %v207_v54  ;;  %v209_v58 = vpop.eup %208  ;;  %v67_v59 = vmul.f32 -0.5, %v207_v54  ;;  %v70_v8 = vand.u32 2147483647, %v207_v54 }
  0x19   :  { %212 = vlog2.f32 %v82_v53  ;;  %v91_v60 = vadd.f32 1.0, %v209_v58  ;;  %v86_v62 = vadd.f32 1.0, %v85_v56  ;;  %v94_v3 = vmul.f32 -0.5, %v209_v58 }
  0x1a   :  { %214 = vlog2.f32 %v64_v55  ;;  %v68_v4 = vadd.f32 1.0, %v67_v59  ;;  %vm302_vm11 = vcmp.lt.f32.partialorder %v88_v2, 0.0004427343  ;;  %v97_v22 = vand.u32 2147483647, %v209_v58 }
  0x1b   :  { %216 = vlog2.f32 %v91_v60  ;;  %v211_v1 = vpop.eup %210  ;;  %v87_v9 = vmul.f32 %v205_v49, %v86_v62  ;;  %v95_v16 = vadd.f32 1.0, %v94_v3  ;;  %vm307_vm12 = vcmp.lt.f32.partialorder %v70_v8, 0.0004427343 }
  0x1c   :  { %v73_v6 = vadd.f32 1.0, %v211_v1  ;;  %v76_v17 = vmul.f32 -0.5, %v211_v1  ;;  %v69_v20 = vmul.f32 %v207_v54, %v68_v4  ;;  %vm98_vm15 = vcmp.lt.f32.partialorder %v97_v22, 0.0004427343 }
  0x1d   :  { %v96_v32 = vmul.f32 %v209_v58, %v95_v16  ;;  %v79_v36 = vand.u32 2147483647, %v211_v1 }
  0x1e   :  { %218 = vlog2.f32 %v73_v6  ;;  %v77_v33 = vadd.f32 1.0, %v76_v17 }
  0x1f   :  { %vm80_vm1 = vcmp.lt.f32.partialorder %v79_v36, 0.0004427343 }
  0x20   :  { %v78_v41 = vmul.f32 %v211_v1, %v77_v33 }
  0x23   :  { %v213_v13 = vpop.eup %212 }
  0x24   :  { %v84_v19 = vmul.f32 0.6931472, %v213_v13  ;;  %v215_v24 = vpop.eup %214 }
  0x25   :  { %v66_v28 = vmul.f32 0.6931472, %v215_v24  ;;  %v217_v35 = vpop.eup %216 }
  0x26   :  { %v90_v27 = vsel %vm302_vm11, %v87_v9, %v84_v19  ;;  %v93_v23 = vmul.f32 0.6931472, %v217_v35 }
  0x27   :  { %v102_v30 = vadd.f32 %v90_v27, %v46_v7  ;;  %v72_v15 = vsel %vm307_vm12, %v69_v20, %v66_v28 }
  0x28   :  { %v100_v38 = vadd.f32 %v72_v15, %v44_v12  ;;  %v99_v40 = vsel %vm98_vm15, %v96_v32, %v93_v23  ;;  %v219_v43 = vpop.eup %218 }
  0x29   :  { %v176_v37 = vsel %vm172_vm13, %v102_v30, 0.0  ;;  %v103_v44 = vadd.f32 %v99_v40, %v47_v26  ;;  %v75_v46 = vmul.f32 0.6931472, %v219_v43 }
  0x2a   :  { %182 = vadd.xlane.f32.xlu1 %v176_v37  ;;  %v174_v39 = vsel %vm170_vm14, %v100_v38, 0.0 }
  0x2b   :  { %178 = vadd.xlane.f32.xlu0 %v174_v39  ;;  %v177_v47 = vsel %vm173_vm0, %v103_v44, 0.0  ;;  %v81_v48 = vsel %vm80_vm1, %v78_v41, %v75_v46 }
  0x2c   :  { %v101_v49 = vadd.f32 %v81_v48, %v45_v45 }
  0x2e   :  { %184 = vadd.xlane.f32.xlu1 %v177_v47  ;;  %v175_v50 = vsel %vm171_vm2, %v101_v49, 0.0 }
  0x2f   :  { %180 = vadd.xlane.f32.xlu0 %v175_v50 }
  0xb7   :  { %v183_v51 = vpop.xlane.xlu1 %182 }
  0xb8   :  { %189 = vst.msk [vmem:[%s332_s2 + $0x10] sm:$0xff] %vm186_vm3, %v183_v51  ;;  %v179_v52 = vpop.xlane.xlu0 %178 }
  0xb9   :  { %187 = vst.msk [vmem:[%s332_s2] sm:$0xff] %vm186_vm3, %v179_v52 }
  0xbb   :  { %v185_v31 = vpop.xlane.xlu1 %184 }
  0xbc   :  { %190 = vst.msk [vmem:[%s332_s2 + $0x18] sm:$0xff] %vm186_vm3, %v185_v31  ;;  %v181_v53 = vpop.xlane.xlu0 %180 }
  0xbd   :  { %188 = vst.msk [vmem:[%s332_s2 + $0x8] sm:$0xff] %vm186_vm3, %v181_v53 }

</bundles_post_ra>
